<compile_context>
chip_gen: v7x
topology: tpu7x:2x2x1
jax: 0.10.0
libtpu: 0.0.40
codegen_flags: <defaults>
</compile_context>

<pallas_src>
import jax
import jax.numpy as jnp
from jax import lax
from jax.experimental import pallas as pl
from jax.experimental.pallas import tpu as pltpu


def _round_up(a: int, b: int) -> int:
    return ((a + b - 1) // b) * b


def _cdiv(a: int, b: int) -> int:
    return (a + b - 1) // b


# x:(tm, tk) . w:(C, tk) contracting on K -> (tm, C)  (== x @ w.T, no transpose copy)
_CONTRACT_K = (((1,), (1,)), ((), ()))


def _dual_head_kernel_f32(x_ref, w1_ref, w2_ref, b1_ref, b2_ref, y1_ref, y2_ref):
    """f32 outputs: accumulate directly into the output blocks (no scratch)."""
    k = pl.program_id(1)

    @pl.when(k == 0)
    def _init():
        y1_ref[...] = jnp.broadcast_to(b1_ref[...], y1_ref.shape).astype(y1_ref.dtype)
        y2_ref[...] = jnp.broadcast_to(b2_ref[...], y2_ref.shape).astype(y2_ref.dtype)

    y1_ref[...] += lax.dot_general(x_ref[...], w1_ref[...], _CONTRACT_K,
                                   preferred_element_type=jnp.float32)
    y2_ref[...] += lax.dot_general(x_ref[...], w2_ref[...], _CONTRACT_K,
                                   preferred_element_type=jnp.float32)


def _dual_head_kernel_lowp(x_ref, w1_ref, w2_ref, b1_ref, b2_ref,
                           y1_ref, y2_ref, acc1_ref, acc2_ref):
    """Sub-32-bit outputs: f32 VMEM accumulators, single cast at the end."""
    k = pl.program_id(1)

    @pl.when(k == 0)
    def _init():
        acc1_ref[...] = jnp.broadcast_to(b1_ref[...].astype(jnp.float32), acc1_ref.shape)
        acc2_ref[...] = jnp.broadcast_to(b2_ref[...].astype(jnp.float32), acc2_ref.shape)

    acc1_ref[...] += lax.dot_general(x_ref[...], w1_ref[...], _CONTRACT_K,
                                     preferred_element_type=jnp.float32)
    acc2_ref[...] += lax.dot_general(x_ref[...], w2_ref[...], _CONTRACT_K,
                                     preferred_element_type=jnp.float32)

    @pl.when(k == pl.num_programs(1) - 1)
    def _finalize():
        y1_ref[...] = acc1_ref[...].astype(y1_ref.dtype)
        y2_ref[...] = acc2_ref[...].astype(y2_ref.dtype)


def _default_vmem_limit_bytes() -> int:
    try:
        cap = pltpu.get_tpu_info().vmem_capacity_bytes
        return min(int(cap * 0.85), 100 * 1024 * 1024)
    except Exception:
        return 48 * 1024 * 1024  # safe on every generation (v7x physical = 64 MiB)


def dual_head(x, w1, b1, w2, b2, *, tm=512, tk=1024, vmem_limit_bytes=None):
    """DualHead forward: returns (x @ w1.T + b1, x @ w2.T + b2) in x.dtype."""
    M, K = x.shape
    C1, C2 = w1.shape[0], w2.shape[0]
    dtype = x.dtype

    # Match parameter dtypes to x (no-ops in the normal case: everything bf16 or f32).
    if w1.dtype != dtype:
        w1 = w1.astype(dtype)
    if w2.dtype != dtype:
        w2 = w2.astype(dtype)
    if b1.dtype != dtype:
        b1 = b1.astype(dtype)
    if b2.dtype != dtype:
        b2 = b2.astype(dtype)
    b1 = b1.reshape(1, C1)
    b2 = b2.reshape(1, C2)

    # ---- K (reduction) tiling: must be covered exactly (zero padded if needed).
    tk = max(int(tk), 128)
    if K <= tk:
        tk_eff, Kp = K, K                       # single reduction step, no padding
    else:
        Kp = _round_up(K, 128)
        units, max_units = Kp // 128, max(tk // 128, 1)
        d = next(d for d in range(max_units, 0, -1) if units % d == 0)
        tk_eff = d * 128
    if Kp != K:  # rare: K > tk and K % 128 != 0; pads are tiny and along K only
        x = jnp.pad(x, ((0, 0), (0, Kp - K)))
        w1 = jnp.pad(w1, ((0, 0), (0, Kp - K)))
        w2 = jnp.pad(w2, ((0, 0), (0, Kp - K)))

    # ---- M tiling: never pad x; edge blocks are masked on writeback.
    if M <= 8:
        tm_eff = M
    else:
        tm_eff = min(int(tm), _round_up(M, 8))
        if _cdiv(M, tm_eff) < 2:                # >=2 blocks on the parallel axis (v7x dual-TC)
            tm_eff = _round_up(_cdiv(M, 2), 8)

    grid = (_cdiv(M, tm_eff), Kp // tk_eff)

    if dtype == jnp.float32:
        kernel = _dual_head_kernel_f32
        scratch_shapes = []
    else:
        kernel = _dual_head_kernel_lowp
        scratch_shapes = [pltpu.VMEM((tm_eff, C1), jnp.float32),
                          pltpu.VMEM((tm_eff, C2), jnp.float32)]

    if vmem_limit_bytes is None:
        vmem_limit_bytes = _default_vmem_limit_bytes()

    in_specs = [
        pl.BlockSpec((tm_eff, tk_eff), lambda i, k: (i, k)),   # x tile
        pl.BlockSpec((C1, tk_eff), lambda i, k: (0, k)),       # w1 (C1, K) — no transpose
        pl.BlockSpec((C2, tk_eff), lambda i, k: (0, k)),       # w2 (C2, K)
        pl.BlockSpec((1, C1), lambda i, k: (0, 0)),            # b1
        pl.BlockSpec((1, C2), lambda i, k: (0, 0)),            # b2
    ]
    out_specs = [
        pl.BlockSpec((tm_eff, C1), lambda i, k: (i, 0)),       # y1 (resident across K)
        pl.BlockSpec((tm_eff, C2), lambda i, k: (i, 0)),       # y2
    ]

    y1, y2 = pl.pallas_call(
        kernel,
        out_shape=(jax.ShapeDtypeStruct((M, C1), dtype),
                   jax.ShapeDtypeStruct((M, C2), dtype)),
        grid_spec=pltpu.PrefetchScalarGridSpec(
            num_scalar_prefetch=0,
            grid=grid,
            in_specs=in_specs,
            out_specs=out_specs,
            scratch_shapes=scratch_shapes,
        ),
        compiler_params=pltpu.CompilerParams(
            dimension_semantics=("parallel", "arbitrary"),
            vmem_limit_bytes=vmem_limit_bytes,
        ),
    )(x, w1, w2, b1, b2)
    return y1, y2


if __name__ == "__main__":
    # --- Small sanity check (shapes implied by the module: x is (batch, in_channels)).
    key = jax.random.PRNGKey(0)
    k1, k2, k3, k4, k5 = jax.random.split(key, 5)
    B, Cin, C1, C2 = 2, 32, 16, 8
    x = jax.random.normal(k1, (B, Cin), dtype=jnp.float32)
    w1 = jax.random.normal(k2, (C1, Cin), dtype=jnp.float32) * 0.1
    b1 = jax.random.normal(k3, (C1,), dtype=jnp.float32) * 0.1
    w2 = jax.random.normal(k4, (C2, Cin), dtype=jnp.float32) * 0.1
    b2 = jax.random.normal(k5, (C2,), dtype=jnp.float32) * 0.1

    y1, y2 = jax.block_until_ready(dual_head(x, w1, b1, w2, b2))
    assert y1.shape == (B, C1) and y2.shape == (B, C2), (y1.shape, y2.shape)
    assert y1.dtype == x.dtype and y2.dtype == x.dtype
    assert jnp.allclose(y1, x @ w1.T + b1, atol=1e-4, rtol=1e-4)
    assert jnp.allclose(y2, x @ w2.T + b2, atol=1e-4, rtol=1e-4)

    # --- Multi-tile f32 check: direct o_ref accumulation over a K grid axis,
    #     M not a multiple of the tile (masked edge writes), >=2 parallel M blocks.
    kb = jax.random.split(jax.random.PRNGKey(1), 5)
    B2, Cin2, C1b, C2b = 72, 2048, 160, 96
    xb = jax.random.normal(kb[0], (B2, Cin2), dtype=jnp.float32)
    w1b = jax.random.normal(kb[1], (C1b, Cin2), dtype=jnp.float32) * 0.02
    b1b = jax.random.normal(kb[2], (C1b,), dtype=jnp.float32) * 0.02
    w2b = jax.random.normal(kb[3], (C2b, Cin2), dtype=jnp.float32) * 0.02
    b2b = jax.random.normal(kb[4], (C2b,), dtype=jnp.float32) * 0.02
    z1, z2 = jax.block_until_ready(dual_head(xb, w1b, b1b, w2b, b2b, tm=32, tk=512))
    ref1 = jnp.dot(xb, w1b.T, precision=lax.Precision.HIGHEST) + b1b
    ref2 = jnp.dot(xb, w2b.T, precision=lax.Precision.HIGHEST) + b2b
    assert jnp.allclose(z1, ref1, atol=2e-2, rtol=2e-2)
    assert jnp.allclose(z2, ref2, atol=2e-2, rtol=2e-2)

    # --- bf16 check: native-dtype MXU feed, f32 scratch accumulators, bf16 outputs.
    xh, w1h, b1h = xb.astype(jnp.bfloat16), w1b.astype(jnp.bfloat16), b1b.astype(jnp.bfloat16)
    w2h, b2h = w2b.astype(jnp.bfloat16), b2b.astype(jnp.bfloat16)
    u1, u2 = jax.block_until_ready(dual_head(xh, w1h, b1h, w2h, b2h))
    assert u1.dtype == jnp.bfloat16 and u2.dtype == jnp.bfloat16
    ref1h = xh.astype(jnp.float32) @ w1h.astype(jnp.float32).T + b1h.astype(jnp.float32)
    ref2h = xh.astype(jnp.float32) @ w2h.astype(jnp.float32).T + b2h.astype(jnp.float32)
    assert jnp.allclose(u1.astype(jnp.float32), ref1h, atol=3e-2, rtol=3e-2)
    assert jnp.allclose(u2.astype(jnp.float32), ref2h, atol=3e-2, rtol=3e-2)

    print("KERNEL_OK")
</pallas_src>

<mosaic_0001>
module attributes {stable_mosaic.version = 11 : i64} {
  func.func @_dual_head_kernel_f32(%arg0: i32, %arg1: i32, %arg2: memref<2x32xf32, #tpu.memory_space<vmem>>, %arg3: memref<16x32xf32, #tpu.memory_space<vmem>>, %arg4: memref<8x32xf32, #tpu.memory_space<vmem>>, %arg5: memref<1x16xf32, #tpu.memory_space<vmem>>, %arg6: memref<1x8xf32, #tpu.memory_space<vmem>>, %arg7: memref<2x16xf32, #tpu.memory_space<vmem>>, %arg8: memref<2x8xf32, #tpu.memory_space<vmem>>) attributes {dimension_semantics = [#tpu.dimension_semantics<parallel>, #tpu.dimension_semantics<arbitrary>], iteration_bounds = array<i64: 1, 1>, scalar_prefetch = 0 : i64, scratch_operands = 0 : i64, tpu.core_type = #tpu.core_type<tc>, window_params = [{transform_indices = @transform_0, window_bounds = array<i64: 2, 32>}, {transform_indices = @transform_1, window_bounds = array<i64: 16, 32>}, {transform_indices = @transform_2, window_bounds = array<i64: 8, 32>}, {pipeline_mode = #tpu.pipeline_mode<synchronous>, transform_indices = @transform_3, window_bounds = array<i64: 1, 16>}, {pipeline_mode = #tpu.pipeline_mode<synchronous>, transform_indices = @transform_4, window_bounds = array<i64: 1, 8>}, {transform_indices = @transform_5, window_bounds = array<i64: 2, 16>}, {transform_indices = @transform_6, window_bounds = array<i64: 2, 8>}]} {
    %c0_i32 = arith.constant 0 : i32
    %0 = arith.cmpi eq, %arg1, %c0_i32 : i32
    %1 = arith.extui %0 : i1 to i32
    %c0_i32_0 = arith.constant 0 : i32
    %2 = arith.cmpi ne, %1, %c0_i32_0 : i32
    scf.if %2 {
      %c0_17 = arith.constant 0 : index
      %c0_18 = arith.constant 0 : index
      %15 = vector.load %arg5[%c0_17, %c0_18] : memref<1x16xf32, #tpu.memory_space<vmem>>, vector<1x16xf32>
      %16 = vector.shape_cast %15 : vector<1x16xf32> to vector<1x16xf32>
      %17 = vector.broadcast %16 : vector<1x16xf32> to vector<2x16xf32>
      %c0_19 = arith.constant 0 : index
      %c0_20 = arith.constant 0 : index
      %18 = vector.load %arg7[%c0_19, %c0_20] : memref<2x16xf32, #tpu.memory_space<vmem>>, vector<2x16xf32>
      tpu.vector_store %arg7[%c0_19, %c0_20], %17 {strides = array<i32>} : memref<2x16xf32, #tpu.memory_space<vmem>>, vector<2x16xf32>,
      %c0_21 = arith.constant 0 : index
      %c0_22 = arith.constant 0 : index
      %19 = vector.load %arg6[%c0_21, %c0_22] : memref<1x8xf32, #tpu.memory_space<vmem>>, vector<1x8xf32>
      %20 = vector.shape_cast %19 : vector<1x8xf32> to vector<1x8xf32>
      %21 = vector.broadcast %20 : vector<1x8xf32> to vector<2x8xf32>
      %c0_23 = arith.constant 0 : index
      %c0_24 = arith.constant 0 : index
      %22 = vector.load %arg8[%c0_23, %c0_24] : memref<2x8xf32, #tpu.memory_space<vmem>>, vector<2x8xf32>
      tpu.vector_store %arg8[%c0_23, %c0_24], %21 {strides = array<i32>} : memref<2x8xf32, #tpu.memory_space<vmem>>, vector<2x8xf32>,
    } else {
    }
    %c0 = arith.constant 0 : index
    %c0_1 = arith.constant 0 : index
    %3 = vector.load %arg7[%c0, %c0_1] : memref<2x16xf32, #tpu.memory_space<vmem>>, vector<2x16xf32>
    %c0_2 = arith.constant 0 : index
    %c0_3 = arith.constant 0 : index
    %4 = vector.load %arg2[%c0_2, %c0_3] : memref<2x32xf32, #tpu.memory_space<vmem>>, vector<2x32xf32>
    %c0_4 = arith.constant 0 : index
    %c0_5 = arith.constant 0 : index
    %5 = vector.load %arg3[%c0_4, %c0_5] : memref<16x32xf32, #tpu.memory_space<vmem>>, vector<16x32xf32>
    %cst = arith.constant dense<0.000000e+00> : vector<2x16xf32>
    %6 = tpu.matmul %4, %5, %cst {dimension_numbers = #tpu.dot_dimension_numbers<[1], [1], [0], [0], [0, 0, 1, 0], [], []>} : vector<2x32xf32>, vector<16x32xf32>, vector<2x16xf32> -> vector<2x16xf32>
    %7 = arith.addf %3, %6 : vector<2x16xf32>
    %c0_6 = arith.constant 0 : index
    %c0_7 = arith.constant 0 : index
    %8 = vector.load %arg7[%c0_6, %c0_7] : memref<2x16xf32, #tpu.memory_space<vmem>>, vector<2x16xf32>
    tpu.vector_store %arg7[%c0_6, %c0_7], %7 {strides = array<i32>} : memref<2x16xf32, #tpu.memory_space<vmem>>, vector<2x16xf32>,
    %c0_8 = arith.constant 0 : index
    %c0_9 = arith.constant 0 : index
    %9 = vector.load %arg8[%c0_8, %c0_9] : memref<2x8xf32, #tpu.memory_space<vmem>>, vector<2x8xf32>
    %c0_10 = arith.constant 0 : index
    %c0_11 = arith.constant 0 : index
    %10 = vector.load %arg2[%c0_10, %c0_11] : memref<2x32xf32, #tpu.memory_space<vmem>>, vector<2x32xf32>
    %c0_12 = arith.constant 0 : index
    %c0_13 = arith.constant 0 : index
    %11 = vector.load %arg4[%c0_12, %c0_13] : memref<8x32xf32, #tpu.memory_space<vmem>>, vector<8x32xf32>
    %cst_14 = arith.constant dense<0.000000e+00> : vector<2x8xf32>
    %12 = tpu.matmul %10, %11, %cst_14 {dimension_numbers = #tpu.dot_dimension_numbers<[1], [1], [0], [0], [0, 0, 1, 0], [], []>} : vector<2x32xf32>, vector<8x32xf32>, vector<2x8xf32> -> vector<2x8xf32>
    %13 = arith.addf %9, %12 : vector<2x8xf32>
    %c0_15 = arith.constant 0 : index
    %c0_16 = arith.constant 0 : index
    %14 = vector.load %arg8[%c0_15, %c0_16] : memref<2x8xf32, #tpu.memory_space<vmem>>, vector<2x8xf32>
    tpu.vector_store %arg8[%c0_15, %c0_16], %13 {strides = array<i32>} : memref<2x8xf32, #tpu.memory_space<vmem>>, vector<2x8xf32>,
    return
  }
  func.func @transform_0(%arg0: i32, %arg1: i32) -> (i32, i32) {
    %c0_i32 = arith.constant 0 : i32
    return %arg0, %arg1 : i32, i32
  }
  func.func @transform_1(%arg0: i32, %arg1: i32) -> (i32, i32) {
    %c0_i32 = arith.constant 0 : i32
    %c0_i32_0 = arith.constant 0 : i32
    return %c0_i32, %arg1 : i32, i32
  }
  func.func @transform_2(%arg0: i32, %arg1: i32) -> (i32, i32) {
    %c0_i32 = arith.constant 0 : i32
    %c0_i32_0 = arith.constant 0 : i32
    return %c0_i32, %arg1 : i32, i32
  }
  func.func @transform_3(%arg0: i32, %arg1: i32) -> (i32, i32) {
    %c0_i32 = arith.constant 0 : i32
    %c0_i32_0 = arith.constant 0 : i32
    %c0_i32_1 = arith.constant 0 : i32
    return %c0_i32, %c0_i32_0 : i32, i32
  }
  func.func @transform_4(%arg0: i32, %arg1: i32) -> (i32, i32) {
    %c0_i32 = arith.constant 0 : i32
    %c0_i32_0 = arith.constant 0 : i32
    %c0_i32_1 = arith.constant 0 : i32
    return %c0_i32, %c0_i32_0 : i32, i32
  }
  func.func @transform_5(%arg0: i32, %arg1: i32) -> (i32, i32) {
    %c0_i32 = arith.constant 0 : i32
    %c0_i32_0 = arith.constant 0 : i32
    return %arg0, %c0_i32 : i32, i32
  }
  func.func @transform_6(%arg0: i32, %arg1: i32) -> (i32, i32) {
    %c0_i32 = arith.constant 0 : i32
    %c0_i32_0 = arith.constant 0 : i32
    return %arg0, %c0_i32 : i32, i32
  }
}

</mosaic_0001>

<bundles_post_ra>
// kernel: tpu_custom_call.1
= control target key start
LH: loop header
LB: loop body
LE: loop exit
PB: predicated region body
PF: predicated region fallthrough
CT: control target
= control target key end

     0   :  { %12 = vsyncpa [#allocation3], 0  ;;  %s553_s0 = inlined_call_operand.hbm [shape: f32[2,32], index: 0, kind: input, shape index: {}]   ;;  %s554_s1 = inlined_call_operand.hbm [shape: f32[16,32], index: 1, kind: input, shape index: {}]   ;;  %s555_s2 = inlined_call_operand.hbm [shape: f32[8,32], index: 2, kind: input, shape index: {}]   ;;  %s556_s3 = inlined_call_operand.vmem [shape: f32[1,16], index: 3, kind: input, shape index: {}]   ;;  %s557_s4 = inlined_call_operand.vmem [shape: f32[1,8], index: 4, kind: input, shape index: {}]   ;;  %s558_s5 = inlined_call_operand.hbm [shape: f32[2,16], index: 5, kind: output, shape index: {0}]   ;;  %s559_s6 = inlined_call_operand.hbm [shape: f32[2,8], index: 6, kind: output, shape index: {1}]  }
   0x1   :  { %13 = vsyncpa [#allocation6], 0 }
   0x2   :  { %14 = vsyncpa [#allocation4], 0 }
   0x3   :  { %15 = vsyncpa [#allocation10], 0  ;;  %s438_s21 = smov [#allocation5]   ;;  %s320_s25 = scalar_lea.hbm %s554_s1, 256 }
   0x4   :  { %s31_s22 = sshll.u32 %s438_s21, 4  ;;  %p321_p0 = scmp.ne.s32.totalorder %s554_s1, %s320_s25  ;;  %s32_s22 = int_to_ptr.vmem [resolvable:$true] %s31_s22 }
   0x5   :  { %p324_p1 = scmp.lt.u32.totalorder %s320_s25, %s554_s1 }
   0x7   :  { %p326_p2 = pnand %p324_p1, %p321_p0 }
   0x9   :  { %329 = shalt.err (!%p326_p2)
}
   0xa   :  { %s330_s30 = scalar_lea.vmem %s32_s22, 256  ;;  %p335_p4 = scmp.lt.s32.totalorder %s32_s22, %s32_s22 }
   0xb   :  { %p331_p3 = scmp.ne.s32.totalorder %s32_s22, %s330_s30  ;;  %p336_p5 = scmp.lt.s32.totalorder %s330_s30, %s330_s30 }
   0xd   :  { %p337_p6 = por %p336_p5, %p335_p4 }
   0xf   :  { %p338_p7 = pnand %p337_p6, %p331_p3 }
  0x11   :  { %341 = shalt.err (!%p338_p7)
}
  0x12   :  { %s439_s7 = smov 128   ;;  %s440_s8 = smov 8  }
  0x13   :  { %37 = dma.hbm_to_vmem [thread:$0]  %s554_s1, 256, %s32_s22, [#allocation6], %s439_s7, %s439_s7, %s440_s8  }
  0x14   :  { %s441_s11 = smov [#allocation2]   ;;  %s442_s13 = smov [#allocation7]  }
  0x15   :  { %s22_s12 = sshll.u32 %s441_s11, 4  ;;  %s44_s14 = sshll.u32 %s442_s13, 4  ;;  %s23_s12 = int_to_ptr.vmem [resolvable:$true] %s22_s12  ;;  %s45_s14 = int_to_ptr.vmem [resolvable:$true] %s44_s14 }
  0x16   :  { %s342_s17 = scalar_lea.hbm %s553_s0, 32 }
  0x17   :  { %p343_p8 = scmp.ne.s32.totalorder %s553_s0, %s342_s17  ;;  %p346_p9 = scmp.lt.u32.totalorder %s342_s17, %s553_s0 }
  0x19   :  { %p348_p10 = pnand %p346_p9, %p343_p8 }
  0x1b   :  { %351 = shalt.err (!%p348_p10)
}
  0x1c   :  { %s352_s1 = scalar_lea.vmem %s23_s12, 32  ;;  %p357_p12 = scmp.lt.s32.totalorder %s23_s12, %s23_s12 }
  0x1d   :  { %p353_p11 = scmp.ne.s32.totalorder %s23_s12, %s352_s1  ;;  %p358_p13 = scmp.lt.s32.totalorder %s352_s1, %s352_s1 }
  0x1f   :  { %p359_p0 = por %p358_p13, %p357_p12 }
  0x21   :  { %p360_p1 = pnand %p359_p0, %p353_p11 }
  0x23   :  { %363 = shalt.err (!%p360_p1)
}
  0x24   :  { %25 = dma.hbm_to_vmem [thread:$0]  %s553_s0, 32, %s23_s12, [#allocation3]  }
  0x25   :  { %s364_s26 = scalar_lea.hbm %s555_s2, 128 }
  0x26   :  { %p365_p2 = scmp.ne.s32.totalorder %s555_s2, %s364_s26  ;;  %p368_p3 = scmp.lt.u32.totalorder %s364_s26, %s555_s2 }
  0x28   :  { %p370_p4 = pnand %p368_p3, %p365_p2 }
  0x2a   :  { %373 = shalt.err (!%p370_p4)
}
  0x2b   :  { %s374_s7 = scalar_lea.vmem %s45_s14, 128  ;;  %p379_p6 = scmp.lt.s32.totalorder %s45_s14, %s45_s14 }
  0x2c   :  { %p375_p5 = scmp.ne.s32.totalorder %s45_s14, %s374_s7  ;;  %p380_p7 = scmp.lt.s32.totalorder %s374_s7, %s374_s7 }
  0x2e   :  { %p381_p8 = por %p380_p7, %p379_p6 }
  0x30   :  { %p382_p9 = pnand %p381_p8, %p375_p5 }
  0x32   :  { %385 = shalt.err (!%p382_p9)
}
  0x33   :  { %47 = dma.hbm_to_vmem [thread:$0]  %s555_s2, 128, %s45_s14, [#allocation6]  }
  0x34   :  { %430 = dma.done.wait [#allocation3], 32  }
  0x35   :  { %431 = vsyncadd [#allocation3], 4294967264 }
  0x36   :  { %432 = dma.done.wait [#allocation6], 384  }
  0x37   :  { %433 = vsyncadd [#allocation6], 4294966912  ;;  %v443_v0 = vmov 0.0|0.0   ;;  %v444_v1 = vmov 0.0   ;;  %vm445_vm0 = vmmov 0   ;;  %vm87_vm1 = vcmask 261120  }
  0x38   :  { %306 = vmatprep.subr.bf16.mxu0 %v443_v0  ;;  %301 = vmatprep.subr.mxu1 %v444_v1  ;;  %vm308_vm2 = vmpackc.low %vm87_vm1, %vm87_vm1  ;;  %vm81_vm3 = vcmask 58368   ;;  %v85_v2 = vld [vmem:[#allocation5] sm:$0xff]  ;;  %v86_v3 = vld [vmem:[#allocation5 + $0x8] sm:$0xff]  ;;  %vm72_vm4 = vcmask 123904   ;;  %s446_s12 = smov [#allocation9]  }
  0x39   :  { %303 = vmatprep.mubr.msk.f32.mxu1 %vm445_vm0, %v444_v1  ;;  %298 = vmatprep.mubr.msk.f32.mxu0 %vm445_vm0, %v444_v1  ;;  %v172_v4 = vld [vmem:[#allocation7] sm:$0xff]  ;;  %v307_v5 = vpack.c.bf16 %v86_v3, %v85_v2  ;;  %v171_v6 = vld [vmem:[#allocation2] sm:$0x3]  ;;  %s268_s13 = sshll.u32 %s446_s12, 4  ;;  %s269_s13 = int_to_ptr.vmem [resolvable:$true] %s268_s13 }
  0x3a   :  { %302 = vmatpush3.xpose.msk.msra.mxu1 %vm87_vm1, %v172_v4  ;;  %v283_v7 = vld [vmem:[%s557_s4] ss:$0 sm:$0xff]  ;;  %s447_s4 = smov [#allocation8]   ;;  %s386_s15 = scalar_lea.vmem %s269_s13, 32 }
  0x3b   :  { %82 = vst.msk [vmem:[#allocation9] sm:$0x3] %vm81_vm3, %v283_v7  ;;  %309 = vmatpush3.bf16.xpose.msk.msra.mxu0 %vm308_vm2, %v307_v5  ;;  %v84_v8 = vld [vmem:[#allocation2] sm:$0x3]  ;;  %s258_s14 = sshll.u32 %s447_s4, 4  ;;  %p387_p10 = scmp.ne.s32.totalorder %s269_s13, %s386_s15  ;;  %s259_s14 = int_to_ptr.vmem [resolvable:$true] %s258_s14 }
  0x3c   :  { %v282_v9 = vld [vmem:[%s556_s3] ss:$0 sm:$0xff]  ;;  %p391_p11 = scmp.lt.s32.totalorder %s269_s13, %s269_s13  ;;  %p392_p12 = scmp.lt.s32.totalorder %s386_s15, %s386_s15 }
  0x3d   :  { %304 = vmatmul.mubr.msk.f32.vlgmr.msra.gmra.mrb[0].mxu1 %vm87_vm1, %v171_v6  ;;  %73 = vst.msk [vmem:[#allocation8] sm:$0x3] %vm72_vm4, %v282_v9 }
  0x3e   :  { %p393_p13 = por %p392_p12, %p391_p11 }
  0x40   :  { %p394_p0 = pnand %p393_p13, %p387_p10 }
  0x42   :  { %299 = vmatmul.mubr.msk.f32.vlgmr.msra.gmra.mrb[0].mxu0 %vm87_vm1, %v84_v8  ;;  %v170_v10 = vld [vmem:[#allocation9] sm:$0x3] }
  0x44   :  { %v83_v14 = vld [vmem:[#allocation8] sm:$0x3] }
 0x110   :  { %v245_v11 = vpop.f32.mrb[0].mxu1 }
 0x111   :  { %v249_v12 = vadd.f32 %v245_v11, %v170_v10  ;;  %v305_v13 = vpop.f32.mrb[1].mxu1 }
 0x113   :  { %251 = vst.msk [vmem:[#allocation9] sm:$0x3] %vm81_vm3, %v249_v12 }
 0x114   :  { %397 = shalt.err (!%p394_p0)
}
 0x115   :  { %s398_s17 = scalar_lea.hbm %s559_s6, 32 }
 0x116   :  { %p399_p1 = scmp.ne.s32.totalorder %s559_s6, %s398_s17  ;;  %p402_p2 = scmp.lt.u32.totalorder %s398_s17, %s559_s6 }
 0x118   :  { %p404_p3 = pnand %p402_p2, %p399_p1 }
 0x11a   :  { %407 = shalt.err (!%p404_p3)
}
 0x11b   :  { %271 = dma.vmem_to_hbm [thread:$0]  %s269_s13, 32, %s559_s6, [#allocation10]   ;;  %v163_v15 = vpop.f32.mrb[0].mxu0 }
 0x11c   :  { %v167_v16 = vadd.f32 %v163_v15, %v83_v14  ;;  %v300_v17 = vpop.f32.mrb[1].mxu0  ;;  %s408_s23 = scalar_lea.vmem %s259_s14, 32  ;;  %p413_p5 = scmp.lt.s32.totalorder %s259_s14, %s259_s14 }
 0x11d   :  { %p409_p4 = scmp.ne.s32.totalorder %s259_s14, %s408_s23  ;;  %p414_p6 = scmp.lt.s32.totalorder %s408_s23, %s408_s23 }
 0x11e   :  { %169 = vst.msk [vmem:[#allocation8] sm:$0x3] %vm72_vm4, %v167_v16 }
 0x11f   :  { %p415_p7 = por %p414_p6, %p413_p5 }
 0x121   :  { %p416_p8 = pnand %p415_p7, %p409_p4 }
 0x123   :  { %419 = shalt.err (!%p416_p8)
}
 0x124   :  { %s420_s26 = scalar_lea.hbm %s558_s5, 32 }
 0x125   :  { %p421_p9 = scmp.ne.s32.totalorder %s558_s5, %s420_s26  ;;  %p424_p10 = scmp.lt.u32.totalorder %s420_s26, %s558_s5 }
 0x127   :  { %p426_p11 = pnand %p424_p10, %p421_p9 }
 0x129   :  { %429 = shalt.err (!%p426_p11)
}
 0x12a   :  { %261 = dma.vmem_to_hbm [thread:$0]  %s259_s14, 32, %s558_s5, [#allocation4]  }
 0x12b   :  { %434 = dma.done.wait [#allocation4], 32  }
 0x12c   :  { %435 = vsyncadd [#allocation4], 4294967264 }
 0x12d   :  { %436 = dma.done.wait [#allocation10], 32  }
 0x12e   :  { %437 = vsyncadd [#allocation10], 4294967264 }
 0x12f   :  { %278 = vsyncpa [#allocation3], 1 }
 0x130   :  { %279 = vsyncpa [#allocation6], 1 }
 0x131   :  { %280 = vsyncpa [#allocation4], 1 }
 0x132   :  { %281 = vsyncpa [#allocation10], 1 }

</bundles_post_ra>
